<compile_context>
chip_gen: v7x
topology: tpu7x:2x2x1
jax: 0.10.0
libtpu: 0.0.40
codegen_flags: <defaults>
</compile_context>

<pallas_src>
import functools

import jax
import jax.numpy as jnp
from jax.experimental import pallas as pl
from jax.experimental.pallas import tpu as pltpu


def _round_up(x, m):
    return ((x + m - 1) // m) * m


def _cdiv(a, b):
    return (a + b - 1) // b


def _default_vmem_limit():
    try:
        cap = pltpu.get_tpu_info().vmem_capacity_bytes
        return int(0.8 * cap)
    except Exception:
        return 64 * 1024 * 1024


def mlp_kernel(x_ref, w1_ref, b1_ref, w2_ref, b2_ref, w3_ref, b3_ref, o_ref):
    cdt = w1_ref.dtype  # compute dtype (bf16 by default, f32 optional)
    # x streams in as f32; cast to the compute dtype on the VPU (free slot)
    # instead of paying an extra XLA pass + HBM round-trip in the wrapper.
    x = x_ref[...].astype(cdt)

    # Layer 1: Linear (MXU, f32 accumulation) + bias + ReLU.
    h = jnp.dot(x, w1_ref[...], preferred_element_type=jnp.float32)
    h = jnp.maximum(h + b1_ref[...], 0.0).astype(cdt)

    # Layer 2: Linear + bias + ReLU.
    h = jnp.dot(h, w2_ref[...], preferred_element_type=jnp.float32)
    h = jnp.maximum(h + b2_ref[...], 0.0).astype(cdt)

    # Layer 3: Linear (logits, no activation).  Output last dim == num_tags
    # (unpadded), so no wasted HBM write bytes for small tag counts.
    out = jnp.dot(h, w3_ref[...], preferred_element_type=jnp.float32)
    o_ref[...] = (out + b3_ref[...]).astype(o_ref.dtype)


def chat_neural_net_forward(x, params, *, compute_dtype=jnp.bfloat16,
                            batch_tile=1024, lane=128,
                            vmem_limit_bytes=None):
    """Fused forward pass of ChatNeuralNet.

    x: (B, input_size) float32.
    params: (w1, b1, w2, b2, w3, b3) with w_i shaped (in_features, out_features)
            (i.e. the transpose of torch's nn.Linear weight) and b_i (out,) or
            (1, out).
    compute_dtype: jnp.bfloat16 (default, f32 accumulation on the MXU) or
                   jnp.float32 (bit-exact vs. the f32 reference; slower).
    """
    w1, b1, w2, b2, w3, b3 = params
    B, in_dim = x.shape
    hid = w1.shape[1]
    num_tags = w3.shape[1]

    if vmem_limit_bytes is None:
        vmem_limit_bytes = _default_vmem_limit()

    # ---- lane-pad the contracted feature dims (zero padding is numerically
    # inert through ReLU and the following matmuls).  num_tags is NOT padded:
    # the output block uses the full (small) last dim. ----
    in_p = _round_up(in_dim, lane)
    hid_p = _round_up(hid, lane)

    def _as_row(b):
        return b.reshape(1, -1).astype(jnp.float32)

    b1p = jnp.pad(_as_row(b1), ((0, 0), (0, hid_p - hid)))
    b2p = jnp.pad(_as_row(b2), ((0, 0), (0, hid_p - hid)))
    b3p = _as_row(b3)

    w1p = jnp.pad(w1, ((0, in_p - in_dim), (0, hid_p - hid)))
    w2p = jnp.pad(w2, ((0, hid_p - hid), (0, hid_p - hid)))
    w3p = jnp.pad(w3, ((0, hid_p - hid), (0, 0)))

    # Weights are cast once in the wrapper (small, one-shot); biases stay f32.
    w1p = w1p.astype(compute_dtype)
    w2p = w2p.astype(compute_dtype)
    w3p = w3p.astype(compute_dtype)

    # ---- VMEM budget check / batch-tile selection ----
    cbytes = jnp.dtype(compute_dtype).itemsize
    w_bytes = (in_p * hid_p + hid_p * hid_p + hid_p * num_tags) * cbytes
    b_bytes = (2 * hid_p + num_tags) * 4
    resident = 2 * (w_bytes + b_bytes)  # conservative: double-buffered fallback
    budget = int(0.75 * vmem_limit_bytes)
    if resident > budget:
        # TODO(synk): add a K-tiled path (grid over hid_p chunks with an f32
        # scratch accumulator) so very large hidden sizes degrade gracefully
        # instead of overflowing VMEM.
        raise NotImplementedError(
            "hidden_size too large for the resident-weight fused kernel")

    def _tile_bytes(t):
        # double-buffered x tile + out tile + f32/bf16 intermediates.
        return 2 * t * in_p * 4 + 2 * t * num_tags * 4 + 3 * t * hid_p * 4

    sub = 8
    bt = _round_up(min(batch_tile, _round_up(B, sub)), sub)
    while bt > sub and resident + _tile_bytes(bt) > budget:
        bt = _round_up(max(bt // 2, sub), sub)

    n_tiles = _cdiv(B, bt)
    # v7x has 2 TensorCores: give the "parallel" grid axis at least 2 steps
    # whenever the batch can be split.
    if n_tiles == 1 and B >= 2 * sub:
        n_tiles = 2
    # Size the tile so the tiles divide the (lightly padded) batch evenly --
    # avoids the "one extra nearly-empty tile" cliff.
    bt = _round_up(_cdiv(B, n_tiles), sub)
    B_p = n_tiles * bt

    # ---- single fused pad of x (rows for batch, cols for lane density). ----
    if B_p != B or in_p != in_dim:
        x = jnp.pad(x, ((0, B_p - B), (0, in_p - in_dim)))

    def _run(single_buffer_weights):
        if single_buffer_weights:
            def res(shape):
                return pl.BlockSpec(shape, lambda i: (0, 0),
                                    pipeline_mode=pl.Buffered(1))
        else:
            def res(shape):
                return pl.BlockSpec(shape, lambda i: (0, 0))

        in_specs = [
            pl.BlockSpec((bt, in_p), lambda i: (i, 0)),   # x tile (streamed)
            res((in_p, hid_p)),    # w1 (resident)
            res((1, hid_p)),       # b1
            res((hid_p, hid_p)),   # w2
            res((1, hid_p)),       # b2
            res((hid_p, num_tags)),  # w3
            res((1, num_tags)),    # b3
        ]
        out_spec = pl.BlockSpec((bt, num_tags), lambda i: (i, 0))

        return pl.pallas_call(
            mlp_kernel,
            out_shape=jax.ShapeDtypeStruct((B_p, num_tags), jnp.float32),
            grid_spec=pltpu.PrefetchScalarGridSpec(
                num_scalar_prefetch=0,
                grid=(n_tiles,),
                in_specs=in_specs,
                out_specs=out_spec,
            ),
            compiler_params=pltpu.CompilerParams(
                dimension_semantics=("parallel",),
                vmem_limit_bytes=vmem_limit_bytes,
            ),
        )(x, w1p, b1p, w2p, b2p, w3p, b3p)

    try:
        out = _run(True)
    except Exception:
        # Fallback if this runtime rejects pipeline_mode=pl.Buffered(1).
        out = _run(False)

    # Only the batch rows can be padded; the tag dim is already exact.
    return out[:B] if B_p != B else out


def init_params(key, input_size, hidden_size, num_tags):
    """Deterministic init mimicking nn.Linear default U(-1/sqrt(fan_in), ...).
    Weights stored as (in_features, out_features) so the kernel does x @ W + b
    (a torch state_dict maps via W = torch_weight.T)."""
    ks = jax.random.split(key, 6)

    def linear(kw, kb, fan_in, fan_out):
        bound = 1.0 / jnp.sqrt(jnp.float32(fan_in))
        w = jax.random.uniform(kw, (fan_in, fan_out), jnp.float32, -bound, bound)
        b = jax.random.uniform(kb, (1, fan_out), jnp.float32, -bound, bound)
        return w, b

    w1, b1 = linear(ks[0], ks[1], input_size, hidden_size)
    w2, b2 = linear(ks[2], ks[3], hidden_size, hidden_size)
    w3, b3 = linear(ks[4], ks[5], hidden_size, num_tags)
    return (w1, b1, w2, b2, w3, b3)


def reference_forward(x, params):
    w1, b1, w2, b2, w3, b3 = params
    h = jnp.maximum(x @ w1 + b1.reshape(1, -1), 0.0)
    h = jnp.maximum(h @ w2 + b2.reshape(1, -1), 0.0)
    return h @ w3 + b3.reshape(1, -1)


if __name__ == "__main__":
    batch, input_size, hidden_size, num_tags = 16, 64, 32, 8

    key = jax.random.PRNGKey(0)
    kx, kp = jax.random.split(key)
    x = jax.random.normal(kx, (batch, input_size), jnp.float32)
    params = init_params(kp, input_size, hidden_size, num_tags)
    ref = reference_forward(x, params)

    # Default bf16 compute path (f32 accumulation) -- looser tolerance.
    out_bf16 = jax.block_until_ready(chat_neural_net_forward(x, params))
    assert out_bf16.shape == (batch, num_tags)
    assert jnp.allclose(out_bf16, ref, atol=5e-2, rtol=5e-2)

    # f32 compute path -- matches the reference tightly.
    out_f32 = jax.block_until_ready(
        chat_neural_net_forward(x, params, compute_dtype=jnp.float32))
    assert out_f32.shape == (batch, num_tags)
    assert jnp.allclose(out_f32, ref, atol=1e-5, rtol=1e-5)

    # Odd, non-tile-aligned batch (exercises the fused row/col padding path).
    x2 = jax.random.normal(kx, (batch + 3, input_size), jnp.float32)
    out2 = jax.block_until_ready(
        chat_neural_net_forward(x2, params, compute_dtype=jnp.float32))
    assert out2.shape == (batch + 3, num_tags)
    assert jnp.allclose(out2, reference_forward(x2, params),
                        atol=1e-5, rtol=1e-5)

    print("KERNEL_OK")
</pallas_src>

<mosaic_0001>
module attributes {stable_mosaic.version = 11 : i64} {
  func.func @mlp_kernel(%arg0: i32, %arg1: memref<8x128xf32, #tpu.memory_space<vmem>>, %arg2: memref<128x128xbf16, #tpu.memory_space<vmem>>, %arg3: memref<1x128xf32, #tpu.memory_space<vmem>>, %arg4: memref<128x128xbf16, #tpu.memory_space<vmem>>, %arg5: memref<1x128xf32, #tpu.memory_space<vmem>>, %arg6: memref<128x8xbf16, #tpu.memory_space<vmem>>, %arg7: memref<1x8xf32, #tpu.memory_space<vmem>>, %arg8: memref<8x8xf32, #tpu.memory_space<vmem>>) attributes {dimension_semantics = [#tpu.dimension_semantics<parallel>], iteration_bounds = array<i64: 2>, scalar_prefetch = 0 : i64, scratch_operands = 0 : i64, tpu.core_type = #tpu.core_type<tc>, window_params = [{transform_indices = @transform_0, window_bounds = array<i64: 8, 128>}, {pipeline_mode = #tpu.pipeline_mode<synchronous>, transform_indices = @transform_1, window_bounds = array<i64: 128, 128>}, {pipeline_mode = #tpu.pipeline_mode<synchronous>, transform_indices = @transform_2, window_bounds = array<i64: 1, 128>}, {pipeline_mode = #tpu.pipeline_mode<synchronous>, transform_indices = @transform_3, window_bounds = array<i64: 128, 128>}, {pipeline_mode = #tpu.pipeline_mode<synchronous>, transform_indices = @transform_4, window_bounds = array<i64: 1, 128>}, {pipeline_mode = #tpu.pipeline_mode<synchronous>, transform_indices = @transform_5, window_bounds = array<i64: 128, 8>}, {pipeline_mode = #tpu.pipeline_mode<synchronous>, transform_indices = @transform_6, window_bounds = array<i64: 1, 8>}, {transform_indices = @transform_7, window_bounds = array<i64: 8, 8>}]} {
    %c0 = arith.constant 0 : index
    %c0_0 = arith.constant 0 : index
    %0 = vector.load %arg1[%c0, %c0_0] : memref<8x128xf32, #tpu.memory_space<vmem>>, vector<8x128xf32>
    %1 = arith.truncf %0 : vector<8x128xf32> to vector<8x128xbf16>
    %c0_1 = arith.constant 0 : index
    %c0_2 = arith.constant 0 : index
    %2 = vector.load %arg2[%c0_1, %c0_2] : memref<128x128xbf16, #tpu.memory_space<vmem>>, vector<128x128xbf16>
    %cst = arith.constant dense<0.000000e+00> : vector<8x128xf32>
    %3 = tpu.matmul %1, %2, %cst {dimension_numbers = #tpu.dot_dimension_numbers<[1], [0], [0], [1], [0, 0, 1, 1], [], []>} : vector<8x128xbf16>, vector<128x128xbf16>, vector<8x128xf32> -> vector<8x128xf32>
    %c0_3 = arith.constant 0 : index
    %c0_4 = arith.constant 0 : index
    %4 = vector.load %arg3[%c0_3, %c0_4] : memref<1x128xf32, #tpu.memory_space<vmem>>, vector<1x128xf32>
    %5 = vector.broadcast %4 : vector<1x128xf32> to vector<8x128xf32>
    %6 = arith.addf %3, %5 : vector<8x128xf32>
    %cst_5 = arith.constant 0.000000e+00 : f32
    %7 = vector.broadcast %cst_5 : f32 to vector<8x128xf32>
    %8 = arith.maximumf %6, %7 : vector<8x128xf32>
    %9 = arith.truncf %8 : vector<8x128xf32> to vector<8x128xbf16>
    %c0_6 = arith.constant 0 : index
    %c0_7 = arith.constant 0 : index
    %10 = vector.load %arg4[%c0_6, %c0_7] : memref<128x128xbf16, #tpu.memory_space<vmem>>, vector<128x128xbf16>
    %cst_8 = arith.constant dense<0.000000e+00> : vector<8x128xf32>
    %11 = tpu.matmul %9, %10, %cst_8 {dimension_numbers = #tpu.dot_dimension_numbers<[1], [0], [0], [1], [0, 0, 1, 1], [], []>} : vector<8x128xbf16>, vector<128x128xbf16>, vector<8x128xf32> -> vector<8x128xf32>
    %c0_9 = arith.constant 0 : index
    %c0_10 = arith.constant 0 : index
    %12 = vector.load %arg5[%c0_9, %c0_10] : memref<1x128xf32, #tpu.memory_space<vmem>>, vector<1x128xf32>
    %13 = vector.broadcast %12 : vector<1x128xf32> to vector<8x128xf32>
    %14 = arith.addf %11, %13 : vector<8x128xf32>
    %cst_11 = arith.constant 0.000000e+00 : f32
    %15 = vector.broadcast %cst_11 : f32 to vector<8x128xf32>
    %16 = arith.maximumf %14, %15 : vector<8x128xf32>
    %17 = arith.truncf %16 : vector<8x128xf32> to vector<8x128xbf16>
    %c0_12 = arith.constant 0 : index
    %c0_13 = arith.constant 0 : index
    %18 = vector.load %arg6[%c0_12, %c0_13] : memref<128x8xbf16, #tpu.memory_space<vmem>>, vector<128x8xbf16>
    %cst_14 = arith.constant dense<0.000000e+00> : vector<8x8xf32>
    %19 = tpu.matmul %17, %18, %cst_14 {dimension_numbers = #tpu.dot_dimension_numbers<[1], [0], [0], [1], [0, 0, 1, 1], [], []>} : vector<8x128xbf16>, vector<128x8xbf16>, vector<8x8xf32> -> vector<8x8xf32>
    %c0_15 = arith.constant 0 : index
    %c0_16 = arith.constant 0 : index
    %20 = vector.load %arg7[%c0_15, %c0_16] : memref<1x8xf32, #tpu.memory_space<vmem>>, vector<1x8xf32>
    %21 = vector.broadcast %20 : vector<1x8xf32> to vector<8x8xf32>
    %22 = arith.addf %19, %21 : vector<8x8xf32>
    %c0_17 = arith.constant 0 : index
    %c0_18 = arith.constant 0 : index
    %23 = vector.load %arg8[%c0_17, %c0_18] : memref<8x8xf32, #tpu.memory_space<vmem>>, vector<8x8xf32>
    tpu.vector_store %arg8[%c0_17, %c0_18], %22 {strides = array<i32>} : memref<8x8xf32, #tpu.memory_space<vmem>>, vector<8x8xf32>,
    return
  }
  func.func @transform_0(%arg0: i32) -> (i32, i32) {
    %c0_i32 = arith.constant 0 : i32
    %c0_i32_0 = arith.constant 0 : i32
    return %arg0, %c0_i32 : i32, i32
  }
  func.func @transform_1(%arg0: i32) -> (i32, i32) {
    %c0_i32 = arith.constant 0 : i32
    %c0_i32_0 = arith.constant 0 : i32
    %c0_i32_1 = arith.constant 0 : i32
    return %c0_i32, %c0_i32_0 : i32, i32
  }
  func.func @transform_2(%arg0: i32) -> (i32, i32) {
    %c0_i32 = arith.constant 0 : i32
    %c0_i32_0 = arith.constant 0 : i32
    %c0_i32_1 = arith.constant 0 : i32
    return %c0_i32, %c0_i32_0 : i32, i32
  }
  func.func @transform_3(%arg0: i32) -> (i32, i32) {
    %c0_i32 = arith.constant 0 : i32
    %c0_i32_0 = arith.constant 0 : i32
    %c0_i32_1 = arith.constant 0 : i32
    return %c0_i32, %c0_i32_0 : i32, i32
  }
  func.func @transform_4(%arg0: i32) -> (i32, i32) {
    %c0_i32 = arith.constant 0 : i32
    %c0_i32_0 = arith.constant 0 : i32
    %c0_i32_1 = arith.constant 0 : i32
    return %c0_i32, %c0_i32_0 : i32, i32
  }
  func.func @transform_5(%arg0: i32) -> (i32, i32) {
    %c0_i32 = arith.constant 0 : i32
    %c0_i32_0 = arith.constant 0 : i32
    %c0_i32_1 = arith.constant 0 : i32
    return %c0_i32, %c0_i32_0 : i32, i32
  }
  func.func @transform_6(%arg0: i32) -> (i32, i32) {
    %c0_i32 = arith.constant 0 : i32
    %c0_i32_0 = arith.constant 0 : i32
    %c0_i32_1 = arith.constant 0 : i32
    return %c0_i32, %c0_i32_0 : i32, i32
  }
  func.func @transform_7(%arg0: i32) -> (i32, i32) {
    %c0_i32 = arith.constant 0 : i32
    %c0_i32_0 = arith.constant 0 : i32
    return %arg0, %c0_i32 : i32, i32
  }
}

module attributes {stable_mosaic.version = 11 : i64} {
  func.func @mlp_kernel(%arg0: i32, %arg1: memref<8x128xf32, #tpu.memory_space<vmem>>, %arg2: memref<128x128xbf16, #tpu.memory_space<vmem>>, %arg3: memref<1x128xf32, #tpu.memory_space<vmem>>, %arg4: memref<128x128xbf16, #tpu.memory_space<vmem>>, %arg5: memref<1x128xf32, #tpu.memory_space<vmem>>, %arg6: memref<128x8xbf16, #tpu.memory_space<vmem>>, %arg7: memref<1x8xf32, #tpu.memory_space<vmem>>, %arg8: memref<8x8xf32, #tpu.memory_space<vmem>>) attributes {dimension_semantics = [#tpu.dimension_semantics<parallel>], iteration_bounds = array<i64: 2>, scalar_prefetch = 0 : i64, scratch_operands = 0 : i64, tpu.core_type = #tpu.core_type<tc>, window_params = [{transform_indices = @transform_0, window_bounds = array<i64: 8, 128>}, {pipeline_mode = #tpu.pipeline_mode<synchronous>, transform_indices = @transform_1, window_bounds = array<i64: 128, 128>}, {pipeline_mode = #tpu.pipeline_mode<synchronous>, transform_indices = @transform_2, window_bounds = array<i64: 1, 128>}, {pipeline_mode = #tpu.pipeline_mode<synchronous>, transform_indices = @transform_3, window_bounds = array<i64: 128, 128>}, {pipeline_mode = #tpu.pipeline_mode<synchronous>, transform_indices = @transform_4, window_bounds = array<i64: 1, 128>}, {pipeline_mode = #tpu.pipeline_mode<synchronous>, transform_indices = @transform_5, window_bounds = array<i64: 128, 8>}, {pipeline_mode = #tpu.pipeline_mode<synchronous>, transform_indices = @transform_6, window_bounds = array<i64: 1, 8>}, {transform_indices = @transform_7, window_bounds = array<i64: 8, 8>}]} {
    %c0 = arith.constant 0 : index
    %c0_0 = arith.constant 0 : index
    %0 = vector.load %arg1[%c0, %c0_0] : memref<8x128xf32, #tpu.memory_space<vmem>>, vector<8x128xf32>
    %1 = arith.truncf %0 : vector<8x128xf32> to vector<8x128xbf16>
    %c0_1 = arith.constant 0 : index
    %c0_2 = arith.constant 0 : index
    %2 = vector.load %arg2[%c0_1, %c0_2] : memref<128x128xbf16, #tpu.memory_space<vmem>>, vector<128x128xbf16>
    %cst = arith.constant dense<0.000000e+00> : vector<8x128xf32>
    %3 = tpu.matmul %1, %2, %cst {dimension_numbers = #tpu.dot_dimension_numbers<[1], [0], [0], [1], [0, 0, 1, 1], [], []>} : vector<8x128xbf16>, vector<128x128xbf16>, vector<8x128xf32> -> vector<8x128xf32>
    %c0_3 = arith.constant 0 : index
    %c0_4 = arith.constant 0 : index
    %4 = vector.load %arg3[%c0_3, %c0_4] : memref<1x128xf32, #tpu.memory_space<vmem>>, vector<1x128xf32>
    %5 = vector.broadcast %4 : vector<1x128xf32> to vector<8x128xf32>
    %6 = arith.addf %3, %5 : vector<8x128xf32>
    %cst_5 = arith.constant 0.000000e+00 : f32
    %7 = vector.broadcast %cst_5 : f32 to vector<8x128xf32>
    %8 = arith.maximumf %6, %7 : vector<8x128xf32>
    %9 = arith.truncf %8 : vector<8x128xf32> to vector<8x128xbf16>
    %c0_6 = arith.constant 0 : index
    %c0_7 = arith.constant 0 : index
    %10 = vector.load %arg4[%c0_6, %c0_7] : memref<128x128xbf16, #tpu.memory_space<vmem>>, vector<128x128xbf16>
    %cst_8 = arith.constant dense<0.000000e+00> : vector<8x128xf32>
    %11 = tpu.matmul %9, %10, %cst_8 {dimension_numbers = #tpu.dot_dimension_numbers<[1], [0], [0], [1], [0, 0, 1, 1], [], []>} : vector<8x128xbf16>, vector<128x128xbf16>, vector<8x128xf32> -> vector<8x128xf32>
    %c0_9 = arith.constant 0 : index
    %c0_10 = arith.constant 0 : index
    %12 = vector.load %arg5[%c0_9, %c0_10] : memref<1x128xf32, #tpu.memory_space<vmem>>, vector<1x128xf32>
    %13 = vector.broadcast %12 : vector<1x128xf32> to vector<8x128xf32>
    %14 = arith.addf %11, %13 : vector<8x128xf32>
    %cst_11 = arith.constant 0.000000e+00 : f32
    %15 = vector.broadcast %cst_11 : f32 to vector<8x128xf32>
    %16 = arith.maximumf %14, %15 : vector<8x128xf32>
    %17 = arith.truncf %16 : vector<8x128xf32> to vector<8x128xbf16>
    %c0_12 = arith.constant 0 : index
    %c0_13 = arith.constant 0 : index
    %18 = vector.load %arg6[%c0_12, %c0_13] : memref<128x8xbf16, #tpu.memory_space<vmem>>, vector<128x8xbf16>
    %cst_14 = arith.constant dense<0.000000e+00> : vector<8x8xf32>
    %19 = tpu.matmul %17, %18, %cst_14 {dimension_numbers = #tpu.dot_dimension_numbers<[1], [0], [0], [1], [0, 0, 1, 1], [], []>} : vector<8x128xbf16>, vector<128x8xbf16>, vector<8x8xf32> -> vector<8x8xf32>
    %c0_15 = arith.constant 0 : index
    %c0_16 = arith.constant 0 : index
    %20 = vector.load %arg7[%c0_15, %c0_16] : memref<1x8xf32, #tpu.memory_space<vmem>>, vector<1x8xf32>
    %21 = vector.broadcast %20 : vector<1x8xf32> to vector<8x8xf32>
    %22 = arith.addf %19, %21 : vector<8x8xf32>
    %c0_17 = arith.constant 0 : index
    %c0_18 = arith.constant 0 : index
    %23 = vector.load %arg8[%c0_17, %c0_18] : memref<8x8xf32, #tpu.memory_space<vmem>>, vector<8x8xf32>
    tpu.vector_store %arg8[%c0_17, %c0_18], %22 {strides = array<i32>} : memref<8x8xf32, #tpu.memory_space<vmem>>, vector<8x8xf32>,
    return
  }
  func.func @transform_0(%arg0: i32) -> (i32, i32) {
    %c0_i32 = arith.constant 0 : i32
    %c0_i32_0 = arith.constant 0 : i32
    return %arg0, %c0_i32 : i32, i32
  }
  func.func @transform_1(%arg0: i32) -> (i32, i32) {
    %c0_i32 = arith.constant 0 : i32
    %c0_i32_0 = arith.constant 0 : i32
    %c0_i32_1 = arith.constant 0 : i32
    return %c0_i32, %c0_i32_0 : i32, i32
  }
  func.func @transform_2(%arg0: i32) -> (i32, i32) {
    %c0_i32 = arith.constant 0 : i32
    %c0_i32_0 = arith.constant 0 : i32
    %c0_i32_1 = arith.constant 0 : i32
    return %c0_i32, %c0_i32_0 : i32, i32
  }
  func.func @transform_3(%arg0: i32) -> (i32, i32) {
    %c0_i32 = arith.constant 0 : i32
    %c0_i32_0 = arith.constant 0 : i32
    %c0_i32_1 = arith.constant 0 : i32
    return %c0_i32, %c0_i32_0 : i32, i32
  }
  func.func @transform_4(%arg0: i32) -> (i32, i32) {
    %c0_i32 = arith.constant 0 : i32
    %c0_i32_0 = arith.constant 0 : i32
    %c0_i32_1 = arith.constant 0 : i32
    return %c0_i32, %c0_i32_0 : i32, i32
  }
  func.func @transform_5(%arg0: i32) -> (i32, i32) {
    %c0_i32 = arith.constant 0 : i32
    %c0_i32_0 = arith.constant 0 : i32
    %c0_i32_1 = arith.constant 0 : i32
    return %c0_i32, %c0_i32_0 : i32, i32
  }
  func.func @transform_6(%arg0: i32) -> (i32, i32) {
    %c0_i32 = arith.constant 0 : i32
    %c0_i32_0 = arith.constant 0 : i32
    %c0_i32_1 = arith.constant 0 : i32
    return %c0_i32, %c0_i32_0 : i32, i32
  }
  func.func @transform_7(%arg0: i32) -> (i32, i32) {
    %c0_i32 = arith.constant 0 : i32
    %c0_i32_0 = arith.constant 0 : i32
    return %arg0, %c0_i32 : i32, i32
  }
}

</mosaic_0001>

<bundles_post_ra>
// kernel: tpu_custom_call.1
= control target key start
LH: loop header
LB: loop body
LE: loop exit
PB: predicated region body
PF: predicated region fallthrough
CT: control target
= control target key end

     0   :  { %12 = vsyncpa [#allocation3], 0  ;;  %s1827_s0 = inlined_call_operand.hbm [shape: f32[16,128], index: 0, kind: input, shape index: {}]   ;;  %s1828_s1 = inlined_call_operand.hbm [shape: bf16[128,128], index: 1, kind: input, shape index: {}]   ;;  %s1829_s2 = inlined_call_operand.hbm [shape: f32[1,128], index: 2, kind: input, shape index: {}]   ;;  %s1830_s3 = inlined_call_operand.hbm [shape: bf16[128,128], index: 3, kind: input, shape index: {}]   ;;  %s1831_s4 = inlined_call_operand.hbm [shape: f32[1,128], index: 4, kind: input, shape index: {}]   ;;  %s1832_s5 = inlined_call_operand.hbm [shape: bf16[128,8], index: 5, kind: input, shape index: {}]   ;;  %s1833_s6 = inlined_call_operand.hbm [shape: f32[1,8], index: 6, kind: input, shape index: {}]   ;;  %s1834_s7 = inlined_call_operand.hbm [shape: f32[16,8], index: 7, kind: output, shape index: {}]  }
   0x1   :  { %14 = vsyncpa [#allocation3 + $0x1], 0 }
   0x2   :  { %15 = vsyncpa [#allocation6], 0 }
   0x3   :  { %16 = vsyncpa [#allocation9], 0 }
   0x4   :  { %17 = vsyncpa [#allocation12], 0 }
   0x5   :  { %18 = vsyncpa [#allocation4], 0 }
   0x6   :  { %20 = vsyncpa [#allocation4 + $0x1], 0  ;;  %s1461_s24 = smov 0   ;;  %s1463_s25 = smov 0  }
   0x7   :  { %s1465_s26 = smov 0   ;;  %s1467_s27 = smov 0  }
   0x8 LB: > { %s1409_s28 = smov [#allocation5]   ;;  %s1482_s30 = sadd.s32 4294967295, %s1407_s27   ;;  %s1407_s27 = sphi %s1467_s27, %s1860_s27   ;;  %s1403_s26 = sphi %s1465_s26, %s1859_s26   ;;  %s1399_s25 = sphi %s1463_s25, %s1858_s25   ;;  %s1395_s24 = sphi %s1461_s24, %s1857_s24  }
   0x9   : > { %s221_s29 = sshll.u32 %s1409_s28, 4  ;;  %p859_p0 = scmp.ge.s32.totalorder %s1407_s27, 1  ;;  %s1487_s29 = int_to_ptr.vmem [resolvable:$true] %s221_s29 }
   0xa   : > { %p1835_p1 = scmp.eq.s32.totalorder %s1482_s30, 0  ;;  %p209_p2 = scmp.lt.s32.totalorder %s1407_s27, 3 }
   0xb   : > { %s1410_s9 = smov [#allocation8]   ;;  %s1411_s12 = smov [#allocation11]  }
   0xc   : > { %p1489_p3 = pnand %p859_p0, %p209_p2  ;;  %s245_s10 = sshll.u32 %s1410_s9, 4  ;;  %s1502_s10 = int_to_ptr.vmem [resolvable:$true] %s245_s10 }
   0xd   : > { %s269_s13 = sshll.u32 %s1411_s12, 4  ;;  %s1131_s16 = scalar_lea.hbm %s1828_s1, 1024  ;;  %s1504_s13 = int_to_ptr.vmem [resolvable:$true] %s269_s13 }
   0xe   : > { %s1838_s8 = scalar_select %p1489_p3, 1, 0 }
   0xf   : > { %p1024_p5 = pneg %p1489_p3  ;;  %p1132_p7 = scmp.ne.s32.totalorder %s1828_s1, %s1131_s16 }
  0x10   : > { %p1138_p11 = scmp.lt.u32.totalorder %s1131_s16, %s1828_s1 }
  0x11   : > { %p1498_p6 = pnand %p1024_p5, %p1835_p1 }
  0x13   : > { %p1514_p8 = pneg %p1498_p6 }
  0x15   : > { %p1134_p9 = pnand %p1514_p8, %p1132_p7 }
  0x17   : > { %p1135_p10 = pneg %p1134_p9 }
  0x19   : > { %p1140_p12 = pnand %p1138_p11, %p1135_p10 }
  0x1b   : > { %1143 = shalt.err (!%p1140_p12)
}
  0x1c   : > { %s1144_s22 = scalar_lea.vmem %s1487_s29, 1024  ;;  %p1152_p5 = scmp.lt.s32.totalorder %s1487_s29, %s1487_s29 }
  0x1d   : > { %p1145_p13 = scmp.ne.s32.totalorder %s1487_s29, %s1144_s22  ;;  %p1153_p4 = scmp.lt.s32.totalorder %s1144_s22, %s1144_s22 }
  0x1f   : > { %p1147_p0 = pnand %p1145_p13, %p1514_p8  ;;  %p1154_p7 = por %p1153_p4, %p1152_p5 }
  0x21   : > { %p1148_p2 = pneg %p1147_p0 }
  0x23   : > { %p1155_p9 = pnand %p1154_p7, %p1148_p2 }
  0x25   : > { %1158 = shalt.err (!%p1155_p9)
}
  0x26   : > { %s1412_s23 = smov 64   ;;  %s1413_s28 = smov 4  }
  0x27   : > { %1027 = dma.hbm_to_vmem [thread:$0]  (!%p1498_p6), %s1828_s1, 1024, %s1487_s29, [#allocation6], %s1412_s23, %s1412_s23, %s1413_s28  }
  0x28   : > { %s1159_s16 = scalar_lea.hbm %s1830_s3, 1024 }
  0x29   : > { %p1160_p4 = scmp.ne.s32.totalorder %s1830_s3, %s1159_s16  ;;  %p1166_p12 = scmp.lt.u32.totalorder %s1159_s16, %s1830_s3 }
  0x2b   : > { %p1162_p10 = pnand %p1160_p4, %p1514_p8 }
  0x2d   : > { %p1163_p11 = pneg %p1162_p10 }
  0x2f   : > { %p1168_p13 = pnand %p1166_p12, %p1163_p11 }
  0x31   : > { %1171 = shalt.err (!%p1168_p13)
}
  0x32   : > { %s1172_s29 = scalar_lea.vmem %s1502_s10, 1024  ;;  %p1180_p7 = scmp.lt.s32.totalorder %s1502_s10, %s1502_s10 }
  0x33   : > { %p1173_p0 = scmp.ne.s32.totalorder %s1502_s10, %s1172_s29  ;;  %p1181_p9 = scmp.lt.s32.totalorder %s1172_s29, %s1172_s29 }
  0x35   : > { %p1175_p2 = pnand %p1173_p0, %p1514_p8  ;;  %p1182_p4 = por %p1181_p9, %p1180_p7 }
  0x37   : > { %p1176_p5 = pneg %p1175_p2 }
  0x39   : > { %p1183_p10 = pnand %p1182_p4, %p1176_p5 }
  0x3b   : > { %1186 = shalt.err (!%p1183_p10)
}
  0x3c   : > { %1033 = dma.hbm_to_vmem [thread:$0]  (!%p1498_p6), %s1830_s3, 1024, %s1502_s10, [#allocation9], %s1412_s23, %s1412_s23, %s1413_s28  }
  0x3d   : > { %s1187_s15 = scalar_lea.hbm %s1832_s5, 1024 }
  0x3e   : > { %p1188_p11 = scmp.ne.s32.totalorder %s1832_s5, %s1187_s15  ;;  %p1194_p0 = scmp.lt.u32.totalorder %s1187_s15, %s1832_s5 }
  0x40   : > { %p1190_p12 = pnand %p1188_p11, %p1514_p8 }
  0x42   : > { %p1191_p13 = pneg %p1190_p12 }
  0x44   : > { %p1196_p2 = pnand %p1194_p0, %p1191_p13 }
  0x46   : > { %1199 = shalt.err (!%p1196_p2)
}
  0x47   : > { %s1200_s10 = scalar_lea.vmem %s1504_s13, 1024  ;;  %p1208_p4 = scmp.lt.s32.totalorder %s1504_s13, %s1504_s13 }
  0x48   : > { %p1201_p5 = scmp.ne.s32.totalorder %s1504_s13, %s1200_s10  ;;  %p1209_p10 = scmp.lt.s32.totalorder %s1200_s10, %s1200_s10 }
  0x4a   : > { %p1203_p7 = pnand %p1201_p5, %p1514_p8  ;;  %p1210_p11 = por %p1209_p10, %p1208_p4 }
  0x4c   : > { %p1204_p9 = pneg %p1203_p7 }
  0x4e   : > { %p1211_p12 = pnand %p1210_p11, %p1204_p9 }
  0x50   : > { %1214 = shalt.err (!%p1211_p12)
}
  0x51   : > { %1039 = dma.hbm_to_vmem [thread:$0]  (!%p1498_p6), %s1832_s5, 1024, %s1504_s13, [#allocation12], %s1412_s23, %s1412_s23, %s1413_s28  }
  0x52   : > { %s1414_s22 = smov [#allocation7]   ;;  %s1415_s12 = smov [#allocation10]  }
  0x53   : > { %s235_s9 = sshll.u32 %s1414_s22, 4  ;;  %s259_s14 = sshll.u32 %s1415_s12, 4  ;;  %s236_s9 = int_to_ptr.vmem [resolvable:$true] %s235_s9  ;;  %s260_s14 = int_to_ptr.vmem [resolvable:$true] %s259_s14 }
  0x54   : > { %s1215_s17 = scalar_lea.hbm %s1829_s2, 16 }
  0x55   : > { %p1216_p13 = scmp.ne.s32.totalorder %s1829_s2, %s1215_s17  ;;  %p1222_p5 = scmp.lt.u32.totalorder %s1215_s17, %s1829_s2 }
  0x57   : > { %p1218_p0 = pnand %p1216_p13, %p1514_p8 }
  0x59   : > { %p1219_p2 = pneg %p1218_p0 }
  0x5b   : > { %p1224_p7 = pnand %p1222_p5, %p1219_p2 }
  0x5d   : > { %1227 = shalt.err (!%p1224_p7)
}
  0x5e   : > { %s1228_s13 = scalar_lea.vmem %s236_s9, 16  ;;  %s1235_s23 = scalar_lea.vmem %s236_s9, 32 }
  0x5f   : > { %p1229_p9 = scmp.ne.s32.totalorder %s236_s9, %s1228_s13  ;;  %p1236_p11 = scmp.lt.s32.totalorder %s236_s9, %s236_s9 }
  0x60   : > { %p1237_p12 = scmp.lt.s32.totalorder %s1235_s23, %s1228_s13 }
  0x61   : > { %p1231_p4 = pnand %p1229_p9, %p1514_p8 }
  0x62   : > { %p1238_p1 = por %p1237_p12, %p1236_p11 }
  0x63   : > { %p1232_p10 = pneg %p1231_p4 }
  0x65   : > { %p1239_p3 = pnand %p1238_p1, %p1232_p10 }
  0x67   : > { %1242 = shalt.err (!%p1239_p3)
}
  0x68   : > { %1030 = dma.hbm_to_vmem [thread:$0]  (!%p1498_p6), %s1829_s2, 16, %s236_s9, [#allocation6]  }
  0x69   : > { %s1243_s15 = scalar_lea.hbm %s1831_s4, 16 }
  0x6a   : > { %p1244_p13 = scmp.ne.s32.totalorder %s1831_s4, %s1243_s15  ;;  %p1250_p3 = scmp.lt.u32.totalorder %s1243_s15, %s1831_s4 }
  0x6c   : > { %p1246_p0 = pnand %p1244_p13, %p1514_p8 }
  0x6e   : > { %p1247_p1 = pneg %p1246_p0 }
  0x70   : > { %p1252_p2 = pnand %p1250_p3, %p1247_p1 }
  0x72   : > { %1255 = shalt.err (!%p1252_p2)
}
  0x73   : > { %s1256_s10 = scalar_lea.vmem %s260_s14, 16  ;;  %s1263_s9 = scalar_lea.vmem %s260_s14, 32 }
  0x74   : > { %p1257_p5 = scmp.ne.s32.totalorder %s260_s14, %s1256_s10  ;;  %p1264_p4 = scmp.lt.s32.totalorder %s260_s14, %s260_s14 }
  0x75   : > { %p1265_p10 = scmp.lt.s32.totalorder %s1263_s9, %s1256_s10 }
  0x76   : > { %p1259_p7 = pnand %p1257_p5, %p1514_p8 }
  0x77   : > { %p1266_p11 = por %p1265_p10, %p1264_p4 }
  0x78   : > { %p1260_p9 = pneg %p1259_p7 }
  0x7a   : > { %p1267_p12 = pnand %p1266_p11, %p1260_p9 }
  0x7c   : > { %1270 = shalt.err (!%p1267_p12)
}
  0x7d   : > { %1036 = dma.hbm_to_vmem [thread:$0]  (!%p1498_p6), %s1831_s4, 16, %s260_s14, [#allocation9]  }
  0x7e   : > { %s1416_s23 = smov [#allocation13]   ;;  %s1271_s12 = scalar_lea.hbm %s1833_s6, 16 }
  0x7f   : > { %s283_s28 = sshll.u32 %s1416_s23, 4  ;;  %p1272_p13 = scmp.ne.s32.totalorder %s1833_s6, %s1271_s12  ;;  %s284_s28 = int_to_ptr.vmem [resolvable:$true] %s283_s28 }
  0x80   : > { %p1278_p3 = scmp.lt.u32.totalorder %s1271_s12, %s1833_s6 }
  0x81   : > { %p1274_p0 = pnand %p1272_p13, %p1514_p8 }
  0x83   : > { %p1275_p1 = pneg %p1274_p0 }
  0x85   : > { %p1280_p2 = pnand %p1278_p3, %p1275_p1 }
  0x87   : > { %1283 = shalt.err (!%p1280_p2)
}
  0x88   : > { %s1284_s14 = scalar_lea.vmem %s284_s28, 16  ;;  %s1291_s20 = scalar_lea.vmem %s284_s28, 32 }
  0x89   : > { %p1285_p5 = scmp.ne.s32.totalorder %s284_s28, %s1284_s14  ;;  %p1292_p4 = scmp.lt.s32.totalorder %s284_s28, %s284_s28 }
  0x8a   : > { %p1293_p10 = scmp.lt.s32.totalorder %s1291_s20, %s1284_s14 }
  0x8b   : > { %p1287_p7 = pnand %p1285_p5, %p1514_p8 }
  0x8c   : > { %p1294_p11 = por %p1293_p10, %p1292_p4 }
  0x8d   : > { %p1288_p9 = pneg %p1287_p7 }
  0x8f   : > { %p1295_p12 = pnand %p1294_p11, %p1288_p9 }
  0x91   : > { %1298 = shalt.err (!%p1295_p12)
}
  0x92   : > { %1042 = dma.hbm_to_vmem [thread:$0]  (!%p1498_p6), %s1833_s6, 16, %s284_s28, [#allocation12]  }
  0x93   : > { %s858_s19 = sadd.s32 4294967294, %s1407_s27   ;;  %s1646_s11 = sadd.s32 1, %s1407_s27  }
  0x94   : > { %s30_s21 = ssub.s32 %s1407_s27, %s1646_s11  ;;  %s33_s13 = sadd.s32 1, %s1403_s26 }
  0x95   : > { %p31_p8 = scmp.eq.s32.totalorder %s30_s21, 0  ;;  %p40_p13 = scmp.ne.s32.totalorder %s1403_s26, %s1399_s25 }
  0x96   : > { %p41_p0 = scmp.eq.s32.totalorder %s1407_s27, 0  ;;  %p46_p1 = scmp.ne.s32.totalorder %s1399_s25, %s1395_s24 }
  0x97   : > { %s1657_s23 = scalar_select %p31_p8, %s1403_s26, %s33_s13  }
  0x98   : > { %p1659_p3 = por %p41_p0, %p40_p13  ;;  %p1842_p2 = scmp.eq.s32.totalorder %s1482_s30, 0 }
  0x99   : > { %p196_p5 = scmp.eq.s32.totalorder %s1482_s30, 1  ;;  %p202_p7 = scmp.eq.s32.totalorder %s858_s19, 1 }
  0x9a   : > { %p1665_p6 = por %p1842_p2, %p46_p1  ;;  %p1057_p9 = scmp.lt.s32.totalorder %s1407_s27, 2 }
  0x9b   : > { %s294_s22 = sand.u32 1, %s1403_s26   ;;  %p1672_p4 = por %p196_p5, %p40_p13 }
  0x9c   : > { %p1676_p10 = por %p202_p7, %p46_p1  ;;  %s867_s16 = sshll.u32 %s294_s22, 3 }
  0x9d   : > { %s1844_s12 = scalar_select %p1672_p4, 1, 0 }
  0x9e   : > { %s1845_s15 = scalar_select %p1676_p10, 1, 0 }
  0x9f   : > { %s868_s17 = sshll.u32 %s1407_s27, 7  ;;  %s298_s10 = scalar_lea.vmem [#allocation2], %s867_s16 }
  0xa0   : > { %s1684_s20 = scalar_lea.hbm %s1827_s0, %s868_s17  ;;  %s305_s9 = sshll.u32 %s298_s10, 4  ;;  %s1686_s9 = int_to_ptr.vmem [resolvable:$true] %s305_s9 }
  0xa1   : > { %p1690_p11 = pnand %p1057_p9, %p1659_p3  ;;  %s295_s21 = scalar_lea.sflag [#allocation3], %s294_s22 }
  0xa2   : > { %s1299_s13 = scalar_lea.hbm %s1684_s20, 128  ;;  %s1304_s18 = scalar_lea.hbm %s1827_s0, 256 }
  0xa3   : > { %p1300_p12 = scmp.ne.s32.totalorder %s1684_s20, %s1299_s13  ;;  %p1301_p8 = pneg %p1690_p11 }
  0xa4   : > { %p1305_p1 = scmp.lt.u32.totalorder %s1684_s20, %s1827_s0  ;;  %p1306_p3 = scmp.lt.u32.totalorder %s1304_s18, %s1299_s13 }
  0xa5   : > { %p1302_p13 = pnand %p1301_p8, %p1300_p12  ;;  %p1308_p5 = scmp.lt.u32.totalorder %s1299_s13, %s1684_s20 }
  0xa6   : > { %p1307_p2 = por %p1306_p3, %p1305_p1 }
  0xa7   : > { %p1303_p0 = pneg %p1302_p13 }
  0xa8   : > { %p1309_p7 = por %p1308_p5, %p1307_p2 }
  0xaa   : > { %p1310_p9 = pnand %p1309_p7, %p1303_p0 }
  0xac   : > { %1313 = shalt.err (!%p1310_p9)
}
  0xad   : > { %s1314_s22 = scalar_lea.vmem %s1686_s9, 128  ;;  %s1417_s10 = smov [#allocation2]  }
  0xae   : > { %p1315_p12 = scmp.ne.s32.totalorder %s1686_s9, %s1314_s22  ;;  %s1319_s16 = sshll.u32 %s1417_s10, 4  ;;  %s1320_s16 = int_to_ptr.vmem [resolvable:$false] %s1319_s16 }
  0xaf   : > { %s1321_s17 = scalar_lea.vmem %s1320_s16, 256  ;;  %p1322_p4 = scmp.lt.s32.totalorder %s1686_s9, %s1320_s16 }
  0xb0   : > { %p1317_p13 = pnand %p1315_p12, %p1301_p8  ;;  %p1323_p1 = scmp.lt.s32.totalorder %s1321_s17, %s1314_s22 }
  0xb2   : > { %p1318_p10 = pneg %p1317_p13  ;;  %p1324_p3 = por %p1323_p1, %p1322_p4 }
  0xb4   : > { %p1325_p2 = pnand %p1324_p3, %p1318_p10 }
  0xb6   : > { %1328 = shalt.err (!%p1325_p2)
}
  0xb7   : > { %1046 = dma.hbm_to_vmem [thread:$0]  (!%p1690_p11), %s1684_s20, 128, %s1686_s9, %s295_s21  }
  0xb8   : > { %p1847_p0 = scmp.ne.s32.totalorder %s1838_s8, 0 }
  0xb9   : > { %s1722_s13 = sand.u32 (!%p1847_p0), 1, %s1399_s25  }
  0xba   : > { %314 = sbr.rel (%p1847_p0) target bundleno = 901 (0x385), region = 48  ;;  %s870_s18 = sshll.u32 (!%p1847_p0), %s1722_s13, 3 }
  0xbb   : > { %s317_s29 = scalar_lea.sflag (!%p1847_p0), [#allocation3], %s1722_s13  ;;  %s1728_s14 = scalar_lea.vmem (!%p1847_p0), [#allocation2], %s870_s18 }
  0xc1   : > { %1374 = dma.done.wait (%p1665_p6), %s317_s29, 128  }
  0xc2   : > { %1376 = vsyncadd (%p1665_p6), %s317_s29, 4294967168  ;;  %p1848_p4 = scmp.eq.s32.totalorder %s1482_s30, 0 }
  0xc4   : > { %1378 = dma.done.wait (%p1848_p4), [#allocation6], 1040   ;;  %p1849_p10 = pmov %p1848_p4 }
  0xc5   : > { %p1850_p11 = pmov %p1848_p4 }
  0xc6   : > { %1380 = vsyncadd (%p1849_p10), [#allocation6], 4294966256 }
  0xc7   : > { %1382 = dma.done.wait (%p1850_p11), [#allocation9], 1040   ;;  %p1851_p8 = pmov %p1848_p4 }
  0xc8   : > { %p1852_p5 = pmov %p1848_p4 }
  0xc9   : > { %1384 = vsyncadd (%p1851_p8), [#allocation9], 4294966256 }
  0xca   : > { %1386 = dma.done.wait (%p1852_p5), [#allocation12], 1040   ;;  %p1853_p7 = pmov %p1848_p4 }
  0xcb   : > { %v1418_v0 = vmov 0.0   ;;  %vm1419_vm0 = vmmov 0   ;;  %v1107_v1 = vld [vmem:[#allocation5] sm:$0xff]   ;;  %v1108_v2 = vld [vmem:[#allocation5 + $0x8] sm:$0xff]   ;;  %v1109_v3 = vld [vmem:[#allocation5 + $0x10] sm:$0xff]   ;;  %s906_s8 = sshll.u32 %s1482_s30, 7 }
  0xcc   : > { %1388 = vsyncadd (%p1853_p7), [#allocation12], 4294966256  ;;  %936 = vmatprep.subr.bf16.mxu0 %v1418_v0  ;;  %952 = vmatprep.mubr.msk.bf16.mxu0 %vm1419_vm0, %v1418_v0  ;;  %v1115_v4 = vld [vmem:[#allocation8] sm:$0xff]   ;;  %v1110_v5 = vld [vmem:[#allocation5 + $0x18] sm:$0xff]   ;;  %s374_s28 = scalar_lea.vmem [#allocation14], %s870_s18  ;;  %vm715_vm1 = vcmask 64512   ;;  %s1783_s21 = scalar_lea.hbm %s1834_s7, %s906_s8 }
  0xcd   : > { %956 = vmatprep.subr.bf16.mxu1 %v1418_v0  ;;  %972 = vmatprep.mubr.msk.bf16.mxu1 %vm1419_vm0, %v1418_v0  ;;  %v1116_v6 = vld [vmem:[#allocation8 + $0x8] sm:$0xff]   ;;  %v1111_v7 = vld [vmem:[#allocation5 + $0x20] sm:$0xff]   ;;  %v1117_v8 = vld [vmem:[#allocation8 + $0x10] sm:$0xff]   ;;  %s731_s20 = sshll.u32 %s374_s28, 4  ;;  %s718_s30 = scalar_lea.sflag [#allocation4], %s1722_s13  ;;  %s1785_s20 = int_to_ptr.vmem [resolvable:$true] %s731_s20 }
  0xce   : > { %937 = vmatpush3.bf16.msra.mxu0 %v1107_v1  ;;  %957 = vmatpush3.bf16.msra.mxu1 %v1115_v4  ;;  %v1112_v9 = vld [vmem:[#allocation5 + $0x28] sm:$0xff]   ;;  %v1118_v10 = vld [vmem:[#allocation8 + $0x18] sm:$0xff]   ;;  %v1113_v11 = vld [vmem:[#allocation5 + $0x30] sm:$0xff]   ;;  %s1329_s22 = scalar_lea.vmem %s1785_s20, 128  ;;  %p1854_p9 = scmp.ne.s32.totalorder %s1844_s12, 0 }
  0xcf   : > { %938 = vmatprep.subr.bf16.mxu0 %v1418_v0  ;;  %958 = vmatprep.subr.bf16.mxu1 %v1418_v0  ;;  %v1119_v12 = vld [vmem:[#allocation8 + $0x20] sm:$0xff]   ;;  %v1114_v13 = vld [vmem:[#allocation5 + $0x38] sm:$0xff]   ;;  %v1120_v15 = vld [vmem:[#allocation8 + $0x28] sm:$0xff]   ;;  %p1330_p6 = scmp.ne.s32.totalorder %s1785_s20, %s1329_s22  ;;  %s1420_s10 = smov [#allocation14]  }
  0xd0   : > { %v376_v14 = vld [vmem:[%s1728_s14] sm:$0xff]  ;;  %v1123_v19 = vld [vmem:[#allocation11] sm:$0xff]   ;;  %v878_v25 = vld [vmem:[#allocation7] ss:$0 sm:$0xff]  ;;  %s1333_s16 = sshll.u32 %s1420_s10, 4  ;;  %s1334_s16 = int_to_ptr.vmem [resolvable:$false] %s1333_s16 }
  0xd1   : > { %v377_v16 = vpack.c.bf16 %v376_v14, %v376_v14  ;;  %v1121_v17 = vld [vmem:[#allocation8 + $0x30] sm:$0xff]   ;;  %v1122_v18 = vld [vmem:[#allocation8 + $0x38] sm:$0xff]   ;;  %v1127_v23 = vld [vmem:[#allocation11 + $0x20] sm:$0xff]   ;;  %p1331_p12 = pnand %p1330_p6, %p1854_p9  ;;  %s1335_s17 = scalar_lea.vmem %s1334_s16, 256 }
  0xd2   : > { %939 = vmatpush3.bf16.msra.mxu0 %v1108_v2  ;;  %959 = vmatpush3.bf16.msra.mxu1 %v1116_v6  ;;  %v1124_v20 = vld [vmem:[#allocation11 + $0x8] sm:$0xff]   ;;  %v1125_v21 = vld [vmem:[#allocation11 + $0x10] sm:$0xff]   ;;  %v1126_v22 = vld [vmem:[#allocation11 + $0x18] sm:$0xff]   ;;  %p1336_p1 = scmp.lt.s32.totalorder %s1785_s20, %s1334_s16  ;;  %p1337_p3 = scmp.lt.s32.totalorder %s1335_s17, %s1329_s22 }
  0xd3   : > { %940 = vmatprep.subr.bf16.mxu0 %v1418_v0  ;;  %960 = vmatprep.subr.bf16.mxu1 %v1418_v0  ;;  %v1128_v24 = vld [vmem:[#allocation11 + $0x28] sm:$0xff]   ;;  %v1129_v33 = vld [vmem:[#allocation11 + $0x30] sm:$0xff]   ;;  %v1130_v34 = vld [vmem:[#allocation11 + $0x38] sm:$0xff]   ;;  %p1332_p13 = pneg %p1331_p12 }
  0xd4   : > { %v887_v35 = vld [vmem:[#allocation10] ss:$0 sm:$0xff]  ;;  %v896_v43 = vld [vmem:[#allocation13] ss:$0 sm:$0xff]  ;;  %p1338_p2 = por %p1337_p3, %p1336_p1 }
  0xd6   : > { %941 = vmatpush3.bf16.msra.mxu0 %v1109_v3  ;;  %961 = vmatpush3.bf16.msra.mxu1 %v1117_v8  ;;  %p1339_p0 = pnand %p1338_p2, %p1332_p13 }
  0xd7   : > { %942 = vmatprep.subr.bf16.mxu0 %v1418_v0  ;;  %962 = vmatprep.subr.bf16.mxu1 %v1418_v0 }
  0xda   : > { %943 = vmatpush3.bf16.msra.mxu0 %v1110_v5  ;;  %963 = vmatpush3.bf16.msra.mxu1 %v1118_v10 }
  0xdb   : > { %944 = vmatprep.subr.bf16.mxu0 %v1418_v0  ;;  %964 = vmatprep.subr.bf16.mxu1 %v1418_v0 }
  0xde   : > { %945 = vmatpush3.bf16.msra.mxu0 %v1111_v7  ;;  %965 = vmatpush3.bf16.msra.mxu1 %v1119_v12 }
  0xdf   : > { %946 = vmatprep.subr.bf16.mxu0 %v1418_v0  ;;  %966 = vmatprep.subr.bf16.mxu1 %v1418_v0 }
  0xe2   : > { %947 = vmatpush3.bf16.msra.mxu0 %v1112_v9  ;;  %967 = vmatpush3.bf16.msra.mxu1 %v1120_v15 }
  0xe3   : > { %948 = vmatprep.subr.bf16.mxu0 %v1418_v0  ;;  %968 = vmatprep.subr.bf16.mxu1 %v1418_v0 }
  0xe6   : > { %949 = vmatpush3.bf16.msra.mxu0 %v1113_v11  ;;  %969 = vmatpush3.bf16.msra.mxu1 %v1121_v17 }
  0xe7   : > { %950 = vmatprep.subr.bf16.mxu0 %v1418_v0  ;;  %970 = vmatprep.subr.bf16.mxu1 %v1418_v0 }
  0xea   : > { %951 = vmatpush3.bf16.msra.mxu0 %v1114_v13  ;;  %971 = vmatpush3.bf16.msra.mxu1 %v1122_v18 }
  0xeb   : > { %976 = vmatprep.subr.bf16.mxu0 %v1418_v0 }
  0xed   : > { %953 = vmatmul.mubr.bf16.vlgmr.msra.gmra.mrb[0].mxu0 %v377_v16 }
  0xee   : > { %992 = vmatprep.mubr.msk.bf16.mxu0 %vm1419_vm0, %v1418_v0  ;;  %977 = vmatpush3.bf16.msra.mxu0 %v1123_v19 }
  0xef   : > { %978 = vmatprep.subr.bf16.mxu0 %v1418_v0 }
  0xf2   : > { %979 = vmatpush3.bf16.msra.mxu0 %v1124_v20 }
  0xf3   : > { %980 = vmatprep.subr.bf16.mxu0 %v1418_v0 }
  0xf6   : > { %981 = vmatpush3.bf16.msra.mxu0 %v1125_v21 }
  0xf7   : > { %982 = vmatprep.subr.bf16.mxu0 %v1418_v0 }
  0xfa   : > { %983 = vmatpush3.bf16.msra.mxu0 %v1126_v22 }
  0xfb   : > { %984 = vmatprep.subr.bf16.mxu0 %v1418_v0 }
  0xfe   : > { %985 = vmatpush3.bf16.msra.mxu0 %v1127_v23 }
  0xff   : > { %986 = vmatprep.subr.bf16.mxu0 %v1418_v0 }
 0x102   : > { %987 = vmatpush3.bf16.msra.mxu0 %v1128_v24 }
 0x103   : > { %988 = vmatprep.subr.bf16.mxu0 %v1418_v0 }
 0x106   : > { %989 = vmatpush3.bf16.msra.mxu0 %v1129_v33 }
 0x107   : > { %990 = vmatprep.subr.bf16.mxu0 %v1418_v0 }
 0x10a   : > { %991 = vmatpush3.bf16.msra.mxu0 %v1130_v34 }
 0x1c0   : > { %v483_v26 = vpop.f32.mrb[0].mxu0 }
 0x1c1   : > { %v484_v27 = vadd.f32 %v878_v25, %v483_v26  ;;  %v954_v28 = vpop.f32.mrb[1].mxu0 }
 0x1c2   : > { %v486_v29 = vpop.f32.mrb[2].mxu0 }
 0x1c3   : > { %v489_v30 = vmax.f32 %v484_v27, 0.0  ;;  %v955_v31 = vpop.f32.mrb[3].mxu0 }
 0x1c5   : > { %v490_v32 = vpack.c.bf16 %v489_v30, %v489_v30 }
 0x1c7   : > { %973 = vmatmul.mubr.bf16.vlgmr.msra.gmra.mrb[0].mxu1 %v490_v32 }
 0x29a   : > { %v596_v36 = vpop.f32.mrb[0].mxu1 }
 0x29b   : > { %v597_v37 = vadd.f32 %v887_v35, %v596_v36  ;;  %v974_v38 = vpop.f32.mrb[1].mxu1 }
 0x29c   : > { %v599_v39 = vpop.f32.mrb[2].mxu1 }
 0x29d   : > { %v602_v40 = vmax.f32 %v597_v37, 0.0  ;;  %v975_v41 = vpop.f32.mrb[3].mxu1 }
 0x29f   : > { %v603_v42 = vpack.c.bf16 %v602_v40, %v602_v40 }
 0x2a1   : > { %993 = vmatmul.mubr.bf16.vlgmr.msra.gmra.mrb[4].mxu0 %v603_v42 }
 0x374   : > { %v709_v44 = vpop.f32.mrb[4].mxu0 }
 0x375   : > { %v710_v45 = vadd.f32 %v896_v43, %v709_v44  ;;  %v994_v46 = vpop.f32.mrb[5].mxu0 }
 0x376   : > { %v712_v47 = vpop.f32.mrb[6].mxu0 }
 0x377   : > { %v995_v48 = vpop.f32.mrb[7].mxu0  ;;  %716 = vst.msk [vmem:[%s374_s28] sm:$0xff] %vm715_vm1, %v710_v45 }
 0x378   : > { %1342 = shalt.err (!%p1339_p0)
}
 0x379   : > { %s1343_s13 = scalar_lea.hbm %s1783_s21, 128  ;;  %s1347_s14 = scalar_lea.hbm %s1834_s7, 256 }
 0x37a   : > { %p1344_p4 = scmp.ne.s32.totalorder %s1783_s21, %s1343_s13  ;;  %p1348_p8 = scmp.lt.u32.totalorder %s1783_s21, %s1834_s7 }
 0x37b   : > { %p1349_p5 = scmp.lt.u32.totalorder %s1347_s14, %s1343_s13  ;;  %p1351_p6 = scmp.lt.u32.totalorder %s1343_s13, %s1783_s21 }
 0x37c   : > { %p1345_p10 = pnand %p1344_p4, %p1854_p9 }
 0x37d   : > { %p1350_p7 = por %p1349_p5, %p1348_p8 }
 0x37e   : > { %p1346_p11 = pneg %p1345_p10 }
 0x37f   : > { %p1352_p12 = por %p1351_p6, %p1350_p7 }
 0x381   : > { %p1353_p13 = pnand %p1352_p12, %p1346_p11 }
 0x383   : > { %1356 = shalt.err (!%p1353_p13)
}
 0x384   : > { %1022 = dma.vmem_to_hbm [thread:$0]  (%p1854_p9), %s1785_s20, 128, %s1783_s21, %s718_s30  }
 0x385 PF: > { %s743_s9 = sand.u32 1, %s1395_s24   ;;  %p1855_p1 = scmp.ne.s32.totalorder %s1845_s15, 0 }
 0x386   : > { %p1856_p3 = scmp.ge.s32.totalorder %s1407_s27, 2  ;;  %s744_s19 = scalar_lea.sflag [#allocation4], %s743_s9 }
 0x388   : > { %p1048_p2 = pnand %p1856_p3, %p1855_p1 }
 0x38a   : > { %1390 = dma.done.wait (!%p1048_p2), %s744_s19, 128  }
 0x38b   : > { %1392 = vsyncadd (!%p1048_p2), %s744_s19, 4294967168  ;;  %p23_p0 = scmp.ge.s32.totalorder %s1646_s11, 4   ;;  %s1857_s24 = smov %s1399_s25 }
 0x38c   : > { %s1858_s25 = smov %s1403_s26  ;;  %s1859_s26 = smov %s1657_s23 }
 0x38d   : > { %s1860_s27 = smov %s1646_s11  ;;  %25 = sbr.rel (!%p23_p0) target bundleno = 8 (0x8), region = 117 }
 0x394   :  { %749 = vsyncpa [#allocation3], 1 }
 0x395   :  { %751 = vsyncpa [#allocation3 + $0x1], 1 }
 0x396   :  { %752 = vsyncpa [#allocation6], 1 }
 0x397   :  { %753 = vsyncpa [#allocation9], 1 }
 0x398   :  { %754 = vsyncpa [#allocation12], 1 }
 0x399   :  { %755 = vsyncpa [#allocation4], 1 }
 0x39a   :  { %757 = vsyncpa [#allocation4 + $0x1], 1 }

// kernel: tpu_custom_call.1
= control target key start
LH: loop header
LB: loop body
LE: loop exit
PB: predicated region body
PF: predicated region fallthrough
CT: control target
= control target key end

     0   :  { %12 = vsyncpa [#allocation3], 0  ;;  %s1827_s0 = inlined_call_operand.hbm [shape: f32[16,128], index: 0, kind: input, shape index: {}]   ;;  %s1828_s1 = inlined_call_operand.hbm [shape: bf16[128,128], index: 1, kind: input, shape index: {}]   ;;  %s1829_s2 = inlined_call_operand.hbm [shape: f32[1,128], index: 2, kind: input, shape index: {}]   ;;  %s1830_s3 = inlined_call_operand.hbm [shape: bf16[128,128], index: 3, kind: input, shape index: {}]   ;;  %s1831_s4 = inlined_call_operand.hbm [shape: f32[1,128], index: 4, kind: input, shape index: {}]   ;;  %s1832_s5 = inlined_call_operand.hbm [shape: bf16[128,8], index: 5, kind: input, shape index: {}]   ;;  %s1833_s6 = inlined_call_operand.hbm [shape: f32[1,8], index: 6, kind: input, shape index: {}]   ;;  %s1834_s7 = inlined_call_operand.hbm [shape: f32[16,8], index: 7, kind: output, shape index: {}]  }
   0x1   :  { %14 = vsyncpa [#allocation3 + $0x1], 0 }
   0x2   :  { %15 = vsyncpa [#allocation6], 0 }
   0x3   :  { %16 = vsyncpa [#allocation9], 0 }
   0x4   :  { %17 = vsyncpa [#allocation12], 0 }
   0x5   :  { %18 = vsyncpa [#allocation4], 0 }
   0x6   :  { %20 = vsyncpa [#allocation4 + $0x1], 0  ;;  %s1461_s24 = smov 0   ;;  %s1463_s25 = smov 0  }
   0x7   :  { %s1465_s26 = smov 0   ;;  %s1467_s27 = smov 0  }
   0x8 LB: > { %s1409_s28 = smov [#allocation5]   ;;  %s1482_s30 = sadd.s32 4294967295, %s1407_s27   ;;  %s1407_s27 = sphi %s1467_s27, %s1860_s27   ;;  %s1403_s26 = sphi %s1465_s26, %s1859_s26   ;;  %s1399_s25 = sphi %s1463_s25, %s1858_s25   ;;  %s1395_s24 = sphi %s1461_s24, %s1857_s24  }
   0x9   : > { %s221_s29 = sshll.u32 %s1409_s28, 4  ;;  %p859_p0 = scmp.ge.s32.totalorder %s1407_s27, 1  ;;  %s1487_s29 = int_to_ptr.vmem [resolvable:$true] %s221_s29 }
   0xa   : > { %p1835_p1 = scmp.eq.s32.totalorder %s1482_s30, 0  ;;  %p209_p2 = scmp.lt.s32.totalorder %s1407_s27, 3 }
   0xb   : > { %s1410_s9 = smov [#allocation8]   ;;  %s1411_s12 = smov [#allocation11]  }
   0xc   : > { %p1489_p3 = pnand %p859_p0, %p209_p2  ;;  %s245_s10 = sshll.u32 %s1410_s9, 4  ;;  %s1502_s10 = int_to_ptr.vmem [resolvable:$true] %s245_s10 }
   0xd   : > { %s269_s13 = sshll.u32 %s1411_s12, 4  ;;  %s1131_s16 = scalar_lea.hbm %s1828_s1, 1024  ;;  %s1504_s13 = int_to_ptr.vmem [resolvable:$true] %s269_s13 }
   0xe   : > { %s1838_s8 = scalar_select %p1489_p3, 1, 0 }
   0xf   : > { %p1024_p5 = pneg %p1489_p3  ;;  %p1132_p7 = scmp.ne.s32.totalorder %s1828_s1, %s1131_s16 }
  0x10   : > { %p1138_p11 = scmp.lt.u32.totalorder %s1131_s16, %s1828_s1 }
  0x11   : > { %p1498_p6 = pnand %p1024_p5, %p1835_p1 }
  0x13   : > { %p1514_p8 = pneg %p1498_p6 }
  0x15   : > { %p1134_p9 = pnand %p1514_p8, %p1132_p7 }
  0x17   : > { %p1135_p10 = pneg %p1134_p9 }
  0x19   : > { %p1140_p12 = pnand %p1138_p11, %p1135_p10 }
  0x1b   : > { %1143 = shalt.err (!%p1140_p12)
}
  0x1c   : > { %s1144_s22 = scalar_lea.vmem %s1487_s29, 1024  ;;  %p1152_p5 = scmp.lt.s32.totalorder %s1487_s29, %s1487_s29 }
  0x1d   : > { %p1145_p13 = scmp.ne.s32.totalorder %s1487_s29, %s1144_s22  ;;  %p1153_p4 = scmp.lt.s32.totalorder %s1144_s22, %s1144_s22 }
  0x1f   : > { %p1147_p0 = pnand %p1145_p13, %p1514_p8  ;;  %p1154_p7 = por %p1153_p4, %p1152_p5 }
  0x21   : > { %p1148_p2 = pneg %p1147_p0 }
  0x23   : > { %p1155_p9 = pnand %p1154_p7, %p1148_p2 }
  0x25   : > { %1158 = shalt.err (!%p1155_p9)
}
  0x26   : > { %s1412_s23 = smov 64   ;;  %s1413_s28 = smov 4  }
  0x27   : > { %1027 = dma.hbm_to_vmem [thread:$0]  (!%p1498_p6), %s1828_s1, 1024, %s1487_s29, [#allocation6], %s1412_s23, %s1412_s23, %s1413_s28  }
  0x28   : > { %s1159_s16 = scalar_lea.hbm %s1830_s3, 1024 }
  0x29   : > { %p1160_p4 = scmp.ne.s32.totalorder %s1830_s3, %s1159_s16  ;;  %p1166_p12 = scmp.lt.u32.totalorder %s1159_s16, %s1830_s3 }
  0x2b   : > { %p1162_p10 = pnand %p1160_p4, %p1514_p8 }
  0x2d   : > { %p1163_p11 = pneg %p1162_p10 }
  0x2f   : > { %p1168_p13 = pnand %p1166_p12, %p1163_p11 }
  0x31   : > { %1171 = shalt.err (!%p1168_p13)
}
  0x32   : > { %s1172_s29 = scalar_lea.vmem %s1502_s10, 1024  ;;  %p1180_p7 = scmp.lt.s32.totalorder %s1502_s10, %s1502_s10 }
  0x33   : > { %p1173_p0 = scmp.ne.s32.totalorder %s1502_s10, %s1172_s29  ;;  %p1181_p9 = scmp.lt.s32.totalorder %s1172_s29, %s1172_s29 }
  0x35   : > { %p1175_p2 = pnand %p1173_p0, %p1514_p8  ;;  %p1182_p4 = por %p1181_p9, %p1180_p7 }
  0x37   : > { %p1176_p5 = pneg %p1175_p2 }
  0x39   : > { %p1183_p10 = pnand %p1182_p4, %p1176_p5 }
  0x3b   : > { %1186 = shalt.err (!%p1183_p10)
}
  0x3c   : > { %1033 = dma.hbm_to_vmem [thread:$0]  (!%p1498_p6), %s1830_s3, 1024, %s1502_s10, [#allocation9], %s1412_s23, %s1412_s23, %s1413_s28  }
  0x3d   : > { %s1187_s15 = scalar_lea.hbm %s1832_s5, 1024 }
  0x3e   : > { %p1188_p11 = scmp.ne.s32.totalorder %s1832_s5, %s1187_s15  ;;  %p1194_p0 = scmp.lt.u32.totalorder %s1187_s15, %s1832_s5 }
  0x40   : > { %p1190_p12 = pnand %p1188_p11, %p1514_p8 }
  0x42   : > { %p1191_p13 = pneg %p1190_p12 }
  0x44   : > { %p1196_p2 = pnand %p1194_p0, %p1191_p13 }
  0x46   : > { %1199 = shalt.err (!%p1196_p2)
}
  0x47   : > { %s1200_s10 = scalar_lea.vmem %s1504_s13, 1024  ;;  %p1208_p4 = scmp.lt.s32.totalorder %s1504_s13, %s1504_s13 }
  0x48   : > { %p1201_p5 = scmp.ne.s32.totalorder %s1504_s13, %s1200_s10  ;;  %p1209_p10 = scmp.lt.s32.totalorder %s1200_s10, %s1200_s10 }
  0x4a   : > { %p1203_p7 = pnand %p1201_p5, %p1514_p8  ;;  %p1210_p11 = por %p1209_p10, %p1208_p4 }
  0x4c   : > { %p1204_p9 = pneg %p1203_p7 }
  0x4e   : > { %p1211_p12 = pnand %p1210_p11, %p1204_p9 }
  0x50   : > { %1214 = shalt.err (!%p1211_p12)
}
  0x51   : > { %1039 = dma.hbm_to_vmem [thread:$0]  (!%p1498_p6), %s1832_s5, 1024, %s1504_s13, [#allocation12], %s1412_s23, %s1412_s23, %s1413_s28  }
  0x52   : > { %s1414_s22 = smov [#allocation7]   ;;  %s1415_s12 = smov [#allocation10]  }
  0x53   : > { %s235_s9 = sshll.u32 %s1414_s22, 4  ;;  %s259_s14 = sshll.u32 %s1415_s12, 4  ;;  %s236_s9 = int_to_ptr.vmem [resolvable:$true] %s235_s9  ;;  %s260_s14 = int_to_ptr.vmem [resolvable:$true] %s259_s14 }
  0x54   : > { %s1215_s17 = scalar_lea.hbm %s1829_s2, 16 }
  0x55   : > { %p1216_p13 = scmp.ne.s32.totalorder %s1829_s2, %s1215_s17  ;;  %p1222_p5 = scmp.lt.u32.totalorder %s1215_s17, %s1829_s2 }
  0x57   : > { %p1218_p0 = pnand %p1216_p13, %p1514_p8 }
  0x59   : > { %p1219_p2 = pneg %p1218_p0 }
  0x5b   : > { %p1224_p7 = pnand %p1222_p5, %p1219_p2 }
  0x5d   : > { %1227 = shalt.err (!%p1224_p7)
}
  0x5e   : > { %s1228_s13 = scalar_lea.vmem %s236_s9, 16  ;;  %s1235_s23 = scalar_lea.vmem %s236_s9, 32 }
  0x5f   : > { %p1229_p9 = scmp.ne.s32.totalorder %s236_s9, %s1228_s13  ;;  %p1236_p11 = scmp.lt.s32.totalorder %s236_s9, %s236_s9 }
  0x60   : > { %p1237_p12 = scmp.lt.s32.totalorder %s1235_s23, %s1228_s13 }
  0x61   : > { %p1231_p4 = pnand %p1229_p9, %p1514_p8 }
  0x62   : > { %p1238_p1 = por %p1237_p12, %p1236_p11 }
  0x63   : > { %p1232_p10 = pneg %p1231_p4 }
  0x65   : > { %p1239_p3 = pnand %p1238_p1, %p1232_p10 }
  0x67   : > { %1242 = shalt.err (!%p1239_p3)
}
  0x68   : > { %1030 = dma.hbm_to_vmem [thread:$0]  (!%p1498_p6), %s1829_s2, 16, %s236_s9, [#allocation6]  }
  0x69   : > { %s1243_s15 = scalar_lea.hbm %s1831_s4, 16 }
  0x6a   : > { %p1244_p13 = scmp.ne.s32.totalorder %s1831_s4, %s1243_s15  ;;  %p1250_p3 = scmp.lt.u32.totalorder %s1243_s15, %s1831_s4 }
  0x6c   : > { %p1246_p0 = pnand %p1244_p13, %p1514_p8 }
  0x6e   : > { %p1247_p1 = pneg %p1246_p0 }
  0x70   : > { %p1252_p2 = pnand %p1250_p3, %p1247_p1 }
  0x72   : > { %1255 = shalt.err (!%p1252_p2)
}
  0x73   : > { %s1256_s10 = scalar_lea.vmem %s260_s14, 16  ;;  %s1263_s9 = scalar_lea.vmem %s260_s14, 32 }
  0x74   : > { %p1257_p5 = scmp.ne.s32.totalorder %s260_s14, %s1256_s10  ;;  %p1264_p4 = scmp.lt.s32.totalorder %s260_s14, %s260_s14 }
  0x75   : > { %p1265_p10 = scmp.lt.s32.totalorder %s1263_s9, %s1256_s10 }
  0x76   : > { %p1259_p7 = pnand %p1257_p5, %p1514_p8 }
  0x77   : > { %p1266_p11 = por %p1265_p10, %p1264_p4 }
  0x78   : > { %p1260_p9 = pneg %p1259_p7 }
  0x7a   : > { %p1267_p12 = pnand %p1266_p11, %p1260_p9 }
  0x7c   : > { %1270 = shalt.err (!%p1267_p12)
}
  0x7d   : > { %1036 = dma.hbm_to_vmem [thread:$0]  (!%p1498_p6), %s1831_s4, 16, %s260_s14, [#allocation9]  }
  0x7e   : > { %s1416_s23 = smov [#allocation13]   ;;  %s1271_s12 = scalar_lea.hbm %s1833_s6, 16 }
  0x7f   : > { %s283_s28 = sshll.u32 %s1416_s23, 4  ;;  %p1272_p13 = scmp.ne.s32.totalorder %s1833_s6, %s1271_s12  ;;  %s284_s28 = int_to_ptr.vmem [resolvable:$true] %s283_s28 }
  0x80   : > { %p1278_p3 = scmp.lt.u32.totalorder %s1271_s12, %s1833_s6 }
  0x81   : > { %p1274_p0 = pnand %p1272_p13, %p1514_p8 }
  0x83   : > { %p1275_p1 = pneg %p1274_p0 }
  0x85   : > { %p1280_p2 = pnand %p1278_p3, %p1275_p1 }
  0x87   : > { %1283 = shalt.err (!%p1280_p2)
}
  0x88   : > { %s1284_s14 = scalar_lea.vmem %s284_s28, 16  ;;  %s1291_s20 = scalar_lea.vmem %s284_s28, 32 }
  0x89   : > { %p1285_p5 = scmp.ne.s32.totalorder %s284_s28, %s1284_s14  ;;  %p1292_p4 = scmp.lt.s32.totalorder %s284_s28, %s284_s28 }
  0x8a   : > { %p1293_p10 = scmp.lt.s32.totalorder %s1291_s20, %s1284_s14 }
  0x8b   : > { %p1287_p7 = pnand %p1285_p5, %p1514_p8 }
  0x8c   : > { %p1294_p11 = por %p1293_p10, %p1292_p4 }
  0x8d   : > { %p1288_p9 = pneg %p1287_p7 }
  0x8f   : > { %p1295_p12 = pnand %p1294_p11, %p1288_p9 }
  0x91   : > { %1298 = shalt.err (!%p1295_p12)
}
  0x92   : > { %1042 = dma.hbm_to_vmem [thread:$0]  (!%p1498_p6), %s1833_s6, 16, %s284_s28, [#allocation12]  }
  0x93   : > { %s858_s19 = sadd.s32 4294967294, %s1407_s27   ;;  %s1646_s11 = sadd.s32 1, %s1407_s27  }
  0x94   : > { %s30_s21 = ssub.s32 %s1407_s27, %s1646_s11  ;;  %s33_s13 = sadd.s32 1, %s1403_s26 }
  0x95   : > { %p31_p8 = scmp.eq.s32.totalorder %s30_s21, 0  ;;  %p40_p13 = scmp.ne.s32.totalorder %s1403_s26, %s1399_s25 }
  0x96   : > { %p41_p0 = scmp.eq.s32.totalorder %s1407_s27, 0  ;;  %p46_p1 = scmp.ne.s32.totalorder %s1399_s25, %s1395_s24 }
  0x97   : > { %s1657_s23 = scalar_select %p31_p8, %s1403_s26, %s33_s13  }
  0x98   : > { %p1659_p3 = por %p41_p0, %p40_p13  ;;  %p1842_p2 = scmp.eq.s32.totalorder %s1482_s30, 0 }
  0x99   : > { %p196_p5 = scmp.eq.s32.totalorder %s1482_s30, 1  ;;  %p202_p7 = scmp.eq.s32.totalorder %s858_s19, 1 }
  0x9a   : > { %p1665_p6 = por %p1842_p2, %p46_p1  ;;  %p1057_p9 = scmp.lt.s32.totalorder %s1407_s27, 2 }
  0x9b   : > { %s294_s22 = sand.u32 1, %s1403_s26   ;;  %p1672_p4 = por %p196_p5, %p40_p13 }
  0x9c   : > { %p1676_p10 = por %p202_p7, %p46_p1  ;;  %s867_s16 = sshll.u32 %s294_s22, 3 }
  0x9d   : > { %s1844_s12 = scalar_select %p1672_p4, 1, 0 }
  0x9e   : > { %s1845_s15 = scalar_select %p1676_p10, 1, 0 }
  0x9f   : > { %s868_s17 = sshll.u32 %s1407_s27, 7  ;;  %s298_s10 = scalar_lea.vmem [#allocation2], %s867_s16 }
  0xa0   : > { %s1684_s20 = scalar_lea.hbm %s1827_s0, %s868_s17  ;;  %s305_s9 = sshll.u32 %s298_s10, 4  ;;  %s1686_s9 = int_to_ptr.vmem [resolvable:$true] %s305_s9 }
  0xa1   : > { %p1690_p11 = pnand %p1057_p9, %p1659_p3  ;;  %s295_s21 = scalar_lea.sflag [#allocation3], %s294_s22 }
  0xa2   : > { %s1299_s13 = scalar_lea.hbm %s1684_s20, 128  ;;  %s1304_s18 = scalar_lea.hbm %s1827_s0, 256 }
  0xa3   : > { %p1300_p12 = scmp.ne.s32.totalorder %s1684_s20, %s1299_s13  ;;  %p1301_p8 = pneg %p1690_p11 }
  0xa4   : > { %p1305_p1 = scmp.lt.u32.totalorder %s1684_s20, %s1827_s0  ;;  %p1306_p3 = scmp.lt.u32.totalorder %s1304_s18, %s1299_s13 }
  0xa5   : > { %p1302_p13 = pnand %p1301_p8, %p1300_p12  ;;  %p1308_p5 = scmp.lt.u32.totalorder %s1299_s13, %s1684_s20 }
  0xa6   : > { %p1307_p2 = por %p1306_p3, %p1305_p1 }
  0xa7   : > { %p1303_p0 = pneg %p1302_p13 }
  0xa8   : > { %p1309_p7 = por %p1308_p5, %p1307_p2 }
  0xaa   : > { %p1310_p9 = pnand %p1309_p7, %p1303_p0 }
  0xac   : > { %1313 = shalt.err (!%p1310_p9)
}
  0xad   : > { %s1314_s22 = scalar_lea.vmem %s1686_s9, 128  ;;  %s1417_s10 = smov [#allocation2]  }
  0xae   : > { %p1315_p12 = scmp.ne.s32.totalorder %s1686_s9, %s1314_s22  ;;  %s1319_s16 = sshll.u32 %s1417_s10, 4  ;;  %s1320_s16 = int_to_ptr.vmem [resolvable:$false] %s1319_s16 }
  0xaf   : > { %s1321_s17 = scalar_lea.vmem %s1320_s16, 256  ;;  %p1322_p4 = scmp.lt.s32.totalorder %s1686_s9, %s1320_s16 }
  0xb0   : > { %p1317_p13 = pnand %p1315_p12, %p1301_p8  ;;  %p1323_p1 = scmp.lt.s32.totalorder %s1321_s17, %s1314_s22 }
  0xb2   : > { %p1318_p10 = pneg %p1317_p13  ;;  %p1324_p3 = por %p1323_p1, %p1322_p4 }
  0xb4   : > { %p1325_p2 = pnand %p1324_p3, %p1318_p10 }
  0xb6   : > { %1328 = shalt.err (!%p1325_p2)
}
  0xb7   : > { %1046 = dma.hbm_to_vmem [thread:$0]  (!%p1690_p11), %s1684_s20, 128, %s1686_s9, %s295_s21  }
  0xb8   : > { %p1847_p0 = scmp.ne.s32.totalorder %s1838_s8, 0 }
  0xb9   : > { %s1722_s13 = sand.u32 (!%p1847_p0), 1, %s1399_s25  }
  0xba   : > { %314 = sbr.rel (%p1847_p0) target bundleno = 901 (0x385), region = 48  ;;  %s870_s18 = sshll.u32 (!%p1847_p0), %s1722_s13, 3 }
  0xbb   : > { %s317_s29 = scalar_lea.sflag (!%p1847_p0), [#allocation3], %s1722_s13  ;;  %s1728_s14 = scalar_lea.vmem (!%p1847_p0), [#allocation2], %s870_s18 }
  0xc1   : > { %1374 = dma.done.wait (%p1665_p6), %s317_s29, 128  }
  0xc2   : > { %1376 = vsyncadd (%p1665_p6), %s317_s29, 4294967168  ;;  %p1848_p4 = scmp.eq.s32.totalorder %s1482_s30, 0 }
  0xc4   : > { %1378 = dma.done.wait (%p1848_p4), [#allocation6], 1040   ;;  %p1849_p10 = pmov %p1848_p4 }
  0xc5   : > { %p1850_p11 = pmov %p1848_p4 }
  0xc6   : > { %1380 = vsyncadd (%p1849_p10), [#allocation6], 4294966256 }
  0xc7   : > { %1382 = dma.done.wait (%p1850_p11), [#allocation9], 1040   ;;  %p1851_p8 = pmov %p1848_p4 }
  0xc8   : > { %p1852_p5 = pmov %p1848_p4 }
  0xc9   : > { %1384 = vsyncadd (%p1851_p8), [#allocation9], 4294966256 }
  0xca   : > { %1386 = dma.done.wait (%p1852_p5), [#allocation12], 1040   ;;  %p1853_p7 = pmov %p1848_p4 }
  0xcb   : > { %v1418_v0 = vmov 0.0   ;;  %vm1419_vm0 = vmmov 0   ;;  %v1107_v1 = vld [vmem:[#allocation5] sm:$0xff]   ;;  %v1108_v2 = vld [vmem:[#allocation5 + $0x8] sm:$0xff]   ;;  %v1109_v3 = vld [vmem:[#allocation5 + $0x10] sm:$0xff]   ;;  %s906_s8 = sshll.u32 %s1482_s30, 7 }
  0xcc   : > { %1388 = vsyncadd (%p1853_p7), [#allocation12], 4294966256  ;;  %936 = vmatprep.subr.bf16.mxu0 %v1418_v0  ;;  %952 = vmatprep.mubr.msk.bf16.mxu0 %vm1419_vm0, %v1418_v0  ;;  %v1115_v4 = vld [vmem:[#allocation8] sm:$0xff]   ;;  %v1110_v5 = vld [vmem:[#allocation5 + $0x18] sm:$0xff]   ;;  %s374_s28 = scalar_lea.vmem [#allocation14], %s870_s18  ;;  %vm715_vm1 = vcmask 64512   ;;  %s1783_s21 = scalar_lea.hbm %s1834_s7, %s906_s8 }
  0xcd   : > { %956 = vmatprep.subr.bf16.mxu1 %v1418_v0  ;;  %972 = vmatprep.mubr.msk.bf16.mxu1 %vm1419_vm0, %v1418_v0  ;;  %v1116_v6 = vld [vmem:[#allocation8 + $0x8] sm:$0xff]   ;;  %v1111_v7 = vld [vmem:[#allocation5 + $0x20] sm:$0xff]   ;;  %v1117_v8 = vld [vmem:[#allocation8 + $0x10] sm:$0xff]   ;;  %s731_s20 = sshll.u32 %s374_s28, 4  ;;  %s718_s30 = scalar_lea.sflag [#allocation4], %s1722_s13  ;;  %s1785_s20 = int_to_ptr.vmem [resolvable:$true] %s731_s20 }
  0xce   : > { %937 = vmatpush3.bf16.msra.mxu0 %v1107_v1  ;;  %957 = vmatpush3.bf16.msra.mxu1 %v1115_v4  ;;  %v1112_v9 = vld [vmem:[#allocation5 + $0x28] sm:$0xff]   ;;  %v1118_v10 = vld [vmem:[#allocation8 + $0x18] sm:$0xff]   ;;  %v1113_v11 = vld [vmem:[#allocation5 + $0x30] sm:$0xff]   ;;  %s1329_s22 = scalar_lea.vmem %s1785_s20, 128  ;;  %p1854_p9 = scmp.ne.s32.totalorder %s1844_s12, 0 }
  0xcf   : > { %938 = vmatprep.subr.bf16.mxu0 %v1418_v0  ;;  %958 = vmatprep.subr.bf16.mxu1 %v1418_v0  ;;  %v1119_v12 = vld [vmem:[#allocation8 + $0x20] sm:$0xff]   ;;  %v1114_v13 = vld [vmem:[#allocation5 + $0x38] sm:$0xff]   ;;  %v1120_v15 = vld [vmem:[#allocation8 + $0x28] sm:$0xff]   ;;  %p1330_p6 = scmp.ne.s32.totalorder %s1785_s20, %s1329_s22  ;;  %s1420_s10 = smov [#allocation14]  }
  0xd0   : > { %v376_v14 = vld [vmem:[%s1728_s14] sm:$0xff]  ;;  %v1123_v19 = vld [vmem:[#allocation11] sm:$0xff]   ;;  %v878_v25 = vld [vmem:[#allocation7] ss:$0 sm:$0xff]  ;;  %s1333_s16 = sshll.u32 %s1420_s10, 4  ;;  %s1334_s16 = int_to_ptr.vmem [resolvable:$false] %s1333_s16 }
  0xd1   : > { %v377_v16 = vpack.c.bf16 %v376_v14, %v376_v14  ;;  %v1121_v17 = vld [vmem:[#allocation8 + $0x30] sm:$0xff]   ;;  %v1122_v18 = vld [vmem:[#allocation8 + $0x38] sm:$0xff]   ;;  %v1127_v23 = vld [vmem:[#allocation11 + $0x20] sm:$0xff]   ;;  %p1331_p12 = pnand %p1330_p6, %p1854_p9  ;;  %s1335_s17 = scalar_lea.vmem %s1334_s16, 256 }
  0xd2   : > { %939 = vmatpush3.bf16.msra.mxu0 %v1108_v2  ;;  %959 = vmatpush3.bf16.msra.mxu1 %v1116_v6  ;;  %v1124_v20 = vld [vmem:[#allocation11 + $0x8] sm:$0xff]   ;;  %v1125_v21 = vld [vmem:[#allocation11 + $0x10] sm:$0xff]   ;;  %v1126_v22 = vld [vmem:[#allocation11 + $0x18] sm:$0xff]   ;;  %p1336_p1 = scmp.lt.s32.totalorder %s1785_s20, %s1334_s16  ;;  %p1337_p3 = scmp.lt.s32.totalorder %s1335_s17, %s1329_s22 }
  0xd3   : > { %940 = vmatprep.subr.bf16.mxu0 %v1418_v0  ;;  %960 = vmatprep.subr.bf16.mxu1 %v1418_v0  ;;  %v1128_v24 = vld [vmem:[#allocation11 + $0x28] sm:$0xff]   ;;  %v1129_v33 = vld [vmem:[#allocation11 + $0x30] sm:$0xff]   ;;  %v1130_v34 = vld [vmem:[#allocation11 + $0x38] sm:$0xff]   ;;  %p1332_p13 = pneg %p1331_p12 }
  0xd4   : > { %v887_v35 = vld [vmem:[#allocation10] ss:$0 sm:$0xff]  ;;  %v896_v43 = vld [vmem:[#allocation13] ss:$0 sm:$0xff]  ;;  %p1338_p2 = por %p1337_p3, %p1336_p1 }
  0xd6   : > { %941 = vmatpush3.bf16.msra.mxu0 %v1109_v3  ;;  %961 = vmatpush3.bf16.msra.mxu1 %v1117_v8  ;;  %p1339_p0 = pnand %p1338_p2, %p1332_p13 }
  0xd7   : > { %942 = vmatprep.subr.bf16.mxu0 %v1418_v0  ;;  %962 = vmatprep.subr.bf16.mxu1 %v1418_v0 }
  0xda   : > { %943 = vmatpush3.bf16.msra.mxu0 %v1110_v5  ;;  %963 = vmatpush3.bf16.msra.mxu1 %v1118_v10 }
  0xdb   : > { %944 = vmatprep.subr.bf16.mxu0 %v1418_v0  ;;  %964 = vmatprep.subr.bf16.mxu1 %v1418_v0 }
  0xde   : > { %945 = vmatpush3.bf16.msra.mxu0 %v1111_v7  ;;  %965 = vmatpush3.bf16.msra.mxu1 %v1119_v12 }
  0xdf   : > { %946 = vmatprep.subr.bf16.mxu0 %v1418_v0  ;;  %966 = vmatprep.subr.bf16.mxu1 %v1418_v0 }
  0xe2   : > { %947 = vmatpush3.bf16.msra.mxu0 %v1112_v9  ;;  %967 = vmatpush3.bf16.msra.mxu1 %v1120_v15 }
  0xe3   : > { %948 = vmatprep.subr.bf16.mxu0 %v1418_v0  ;;  %968 = vmatprep.subr.bf16.mxu1 %v1418_v0 }
  0xe6   : > { %949 = vmatpush3.bf16.msra.mxu0 %v1113_v11  ;;  %969 = vmatpush3.bf16.msra.mxu1 %v1121_v17 }
  0xe7   : > { %950 = vmatprep.subr.bf16.mxu0 %v1418_v0  ;;  %970 = vmatprep.subr.bf16.mxu1 %v1418_v0 }
  0xea   : > { %951 = vmatpush3.bf16.msra.mxu0 %v1114_v13  ;;  %971 = vmatpush3.bf16.msra.mxu1 %v1122_v18 }
  0xeb   : > { %976 = vmatprep.subr.bf16.mxu0 %v1418_v0 }
  0xed   : > { %953 = vmatmul.mubr.bf16.vlgmr.msra.gmra.mrb[0].mxu0 %v377_v16 }
  0xee   : > { %992 = vmatprep.mubr.msk.bf16.mxu0 %vm1419_vm0, %v1418_v0  ;;  %977 = vmatpush3.bf16.msra.mxu0 %v1123_v19 }
  0xef   : > { %978 = vmatprep.subr.bf16.mxu0 %v1418_v0 }
  0xf2   : > { %979 = vmatpush3.bf16.msra.mxu0 %v1124_v20 }
  0xf3   : > { %980 = vmatprep.subr.bf16.mxu0 %v1418_v0 }
  0xf6   : > { %981 = vmatpush3.bf16.msra.mxu0 %v1125_v21 }
  0xf7   : > { %982 = vmatprep.subr.bf16.mxu0 %v1418_v0 }
  0xfa   : > { %983 = vmatpush3.bf16.msra.mxu0 %v1126_v22 }
  0xfb   : > { %984 = vmatprep.subr.bf16.mxu0 %v1418_v0 }
  0xfe   : > { %985 = vmatpush3.bf16.msra.mxu0 %v1127_v23 }
  0xff   : > { %986 = vmatprep.subr.bf16.mxu0 %v1418_v0 }
 0x102   : > { %987 = vmatpush3.bf16.msra.mxu0 %v1128_v24 }
 0x103   : > { %988 = vmatprep.subr.bf16.mxu0 %v1418_v0 }
 0x106   : > { %989 = vmatpush3.bf16.msra.mxu0 %v1129_v33 }
 0x107   : > { %990 = vmatprep.subr.bf16.mxu0 %v1418_v0 }
 0x10a   : > { %991 = vmatpush3.bf16.msra.mxu0 %v1130_v34 }
 0x1c0   : > { %v483_v26 = vpop.f32.mrb[0].mxu0 }
 0x1c1   : > { %v484_v27 = vadd.f32 %v878_v25, %v483_v26  ;;  %v954_v28 = vpop.f32.mrb[1].mxu0 }
 0x1c2   : > { %v486_v29 = vpop.f32.mrb[2].mxu0 }
 0x1c3   : > { %v489_v30 = vmax.f32 %v484_v27, 0.0  ;;  %v955_v31 = vpop.f32.mrb[3].mxu0 }
 0x1c5   : > { %v490_v32 = vpack.c.bf16 %v489_v30, %v489_v30 }
 0x1c7   : > { %973 = vmatmul.mubr.bf16.vlgmr.msra.gmra.mrb[0].mxu1 %v490_v32 }
 0x29a   : > { %v596_v36 = vpop.f32.mrb[0].mxu1 }
 0x29b   : > { %v597_v37 = vadd.f32 %v887_v35, %v596_v36  ;;  %v974_v38 = vpop.f32.mrb[1].mxu1 }
 0x29c   : > { %v599_v39 = vpop.f32.mrb[2].mxu1 }
 0x29d   : > { %v602_v40 = vmax.f32 %v597_v37, 0.0  ;;  %v975_v41 = vpop.f32.mrb[3].mxu1 }
 0x29f   : > { %v603_v42 = vpack.c.bf16 %v602_v40, %v602_v40 }
 0x2a1   : > { %993 = vmatmul.mubr.bf16.vlgmr.msra.gmra.mrb[4].mxu0 %v603_v42 }
 0x374   : > { %v709_v44 = vpop.f32.mrb[4].mxu0 }
 0x375   : > { %v710_v45 = vadd.f32 %v896_v43, %v709_v44  ;;  %v994_v46 = vpop.f32.mrb[5].mxu0 }
 0x376   : > { %v712_v47 = vpop.f32.mrb[6].mxu0 }
 0x377   : > { %v995_v48 = vpop.f32.mrb[7].mxu0  ;;  %716 = vst.msk [vmem:[%s374_s28] sm:$0xff] %vm715_vm1, %v710_v45 }
 0x378   : > { %1342 = shalt.err (!%p1339_p0)
}
 0x379   : > { %s1343_s13 = scalar_lea.hbm %s1783_s21, 128  ;;  %s1347_s14 = scalar_lea.hbm %s1834_s7, 256 }
 0x37a   : > { %p1344_p4 = scmp.ne.s32.totalorder %s1783_s21, %s1343_s13  ;;  %p1348_p8 = scmp.lt.u32.totalorder %s1783_s21, %s1834_s7 }
 0x37b   : > { %p1349_p5 = scmp.lt.u32.totalorder %s1347_s14, %s1343_s13  ;;  %p1351_p6 = scmp.lt.u32.totalorder %s1343_s13, %s1783_s21 }
 0x37c   : > { %p1345_p10 = pnand %p1344_p4, %p1854_p9 }
 0x37d   : > { %p1350_p7 = por %p1349_p5, %p1348_p8 }
 0x37e   : > { %p1346_p11 = pneg %p1345_p10 }
 0x37f   : > { %p1352_p12 = por %p1351_p6, %p1350_p7 }
 0x381   : > { %p1353_p13 = pnand %p1352_p12, %p1346_p11 }
 0x383   : > { %1356 = shalt.err (!%p1353_p13)
}
 0x384   : > { %1022 = dma.vmem_to_hbm [thread:$0]  (%p1854_p9), %s1785_s20, 128, %s1783_s21, %s718_s30  }
 0x385 PF: > { %s743_s9 = sand.u32 1, %s1395_s24   ;;  %p1855_p1 = scmp.ne.s32.totalorder %s1845_s15, 0 }
 0x386   : > { %p1856_p3 = scmp.ge.s32.totalorder %s1407_s27, 2  ;;  %s744_s19 = scalar_lea.sflag [#allocation4], %s743_s9 }
 0x388   : > { %p1048_p2 = pnand %p1856_p3, %p1855_p1 }
 0x38a   : > { %1390 = dma.done.wait (!%p1048_p2), %s744_s19, 128  }
 0x38b   : > { %1392 = vsyncadd (!%p1048_p2), %s744_s19, 4294967168  ;;  %p23_p0 = scmp.ge.s32.totalorder %s1646_s11, 4   ;;  %s1857_s24 = smov %s1399_s25 }
 0x38c   : > { %s1858_s25 = smov %s1403_s26  ;;  %s1859_s26 = smov %s1657_s23 }
 0x38d   : > { %s1860_s27 = smov %s1646_s11  ;;  %25 = sbr.rel (!%p23_p0) target bundleno = 8 (0x8), region = 117 }
 0x394   :  { %749 = vsyncpa [#allocation3], 1 }
 0x395   :  { %751 = vsyncpa [#allocation3 + $0x1], 1 }
 0x396   :  { %752 = vsyncpa [#allocation6], 1 }
 0x397   :  { %753 = vsyncpa [#allocation9], 1 }
 0x398   :  { %754 = vsyncpa [#allocation12], 1 }
 0x399   :  { %755 = vsyncpa [#allocation4], 1 }
 0x39a   :  { %757 = vsyncpa [#allocation4 + $0x1], 1 }

</bundles_post_ra>
